<compile_context>
chip_gen: v5e
topology: v5e:2x2
jax: 0.10.0
libtpu: 0.0.40
codegen_flags: <defaults>
</compile_context>

<pallas_src>
import functools

import jax
import jax.numpy as jnp
from jax.experimental import pallas as pl
from jax.experimental.pallas import tpu as pltpu


def _mlp_kernel(x_ref,
                w1_ref, b1_ref,
                w2_ref, b2_ref,
                w3_ref, b3_ref,
                w4_ref, b4_ref,
                o_ref, *, precision):
    x = x_ref[...]                                            # (3, tm) feature-major

    # Layer 1: (16,3) @ (3,tm) -> (16,tm).  K=3 under-fills the MXU, but the
    # kernel is memory/latency bound, so the plain dot is fine and simple.
    h = jnp.dot(w1_ref[...], x, preferred_element_type=jnp.float32,
                precision=precision) + b1_ref[...]
    h = jnp.maximum(h, 0.0)                                   # (16, tm)

    h = jnp.dot(w2_ref[...], h, preferred_element_type=jnp.float32,
                precision=precision) + b2_ref[...]
    h = jnp.maximum(h, 0.0)                                   # (64, tm)

    h = jnp.dot(w3_ref[...], h, preferred_element_type=jnp.float32,
                precision=precision) + b3_ref[...]
    h = jnp.maximum(h, 0.0)                                   # (16, tm)

    h = jnp.dot(w4_ref[...], h, preferred_element_type=jnp.float32,
                precision=precision) + b4_ref[...]
    o_ref[...] = h.astype(o_ref.dtype)                        # (1, tm) lane-dense


def _pick_tile(batch, tm_max):
    """Lane-aligned batch tile: big (fewer ~0.35us grid steps), but >=2 grid
    steps when the batch allows so both v7x TensorCores get work, and capped
    so large-tile VMEM use stays well under the explicit 32 MiB limit."""
    tm_max = max(128, min(int(tm_max), 32768))
    b128 = pl.cdiv(batch, 128) * 128
    tm = min(tm_max, b128)
    if b128 >= 256:  # batch big enough for two tiles
        tm = min(tm, pl.cdiv(pl.cdiv(batch, 2), 128) * 128)
    return max(128, tm)


@functools.partial(jax.jit, static_argnames=("tm", "precision"))
def cbf_model_forward(x, params, *, tm=8192,
                      precision=jax.lax.Precision.HIGHEST):
    """x: (B, 3) float32. params: PyTorch-layout (out,in) weights, (out,1) biases.

    Returns (B, 1) float32, identical semantics to the nn.Sequential forward.
    """
    (w1, b1, w2, b2, w3, b3, w4, b4) = (
        params["w1"], params["b1"], params["w2"], params["b2"],
        params["w3"], params["b3"], params["w4"], params["b4"],
    )
    B = x.shape[0]

    tm_t = _pick_tile(B, tm)
    num_tiles = pl.cdiv(B, tm_t)
    Bp = num_tiles * tm_t

    # Feature-major layout (3, B): single fused pass under jit; no jnp.pad —
    # the last (possibly partial) block's out-of-bounds lanes are undefined
    # and get sliced off below, and the output is allocated at padded width
    # so every store is in-bounds and lane-dense.
    xt = x.T

    def full_block(arr):
        # Whole (tiny) array as one block with a constant block index =>
        # stays resident in VMEM across every grid step.
        return pl.BlockSpec(arr.shape, lambda i: (0, 0))

    grid_spec = pltpu.PrefetchScalarGridSpec(
        num_scalar_prefetch=0,
        grid=(num_tiles,),
        in_specs=[
            pl.BlockSpec((3, tm_t), lambda i: (0, i)),        # x tile (3, tm)
            full_block(w1), full_block(b1),
            full_block(w2), full_block(b2),
            full_block(w3), full_block(b3),
            full_block(w4), full_block(b4),
        ],
        out_specs=pl.BlockSpec((1, tm_t), lambda i: (0, i)),  # lane-dense output
    )

    # flops = 2 * B * (3*16 + 16*64 + 64*16 + 16*1)
    flops = 2 * Bp * (3 * 16 + 16 * 64 + 64 * 16 + 16 * 1)
    param_bytes = 4 * (3 * 16 + 16 * 64 + 64 * 16 + 16 * 1 + 16 + 64 + 16 + 1)
    bytes_accessed = 4 * 3 * B + 4 * Bp + param_bytes

    out = pl.pallas_call(
        functools.partial(_mlp_kernel, precision=precision),
        out_shape=jax.ShapeDtypeStruct((1, Bp), jnp.float32),
        grid_spec=grid_spec,
        compiler_params=pltpu.CompilerParams(
            dimension_semantics=("parallel",),
            vmem_limit_bytes=32 * 1024 * 1024),
        cost_estimate=pl.CostEstimate(
            flops=flops, transcendentals=0, bytes_accessed=bytes_accessed),
    )(xt, w1, b1, w2, b2, w3, b3, w4, b4)

    return out[:, :B].T                                       # (B, 1)


def init_params(key):
    """Deterministic PyTorch-style init: W in (out, in) layout, b as (out, 1)."""
    sizes = [(3, 16), (16, 64), (64, 16), (16, 1)]
    params = {}
    for idx, (fan_in, fan_out) in enumerate(sizes, start=1):
        key, kw, kb = jax.random.split(key, 3)
        bound = 1.0 / jnp.sqrt(jnp.float32(fan_in))
        params[f"w{idx}"] = jax.random.uniform(
            kw, (fan_out, fan_in), jnp.float32, -bound, bound)
        params[f"b{idx}"] = jax.random.uniform(
            kb, (fan_out, 1), jnp.float32, -bound, bound)
    return params


def _reference_forward(x, p):
    # Pure-JAX reference with PyTorch semantics: x @ W.T + b, full fp32.
    hp = jax.lax.Precision.HIGHEST
    h = jnp.maximum(jnp.dot(x, p["w1"].T, precision=hp) + p["b1"].T, 0.0)
    h = jnp.maximum(jnp.dot(h, p["w2"].T, precision=hp) + p["b2"].T, 0.0)
    h = jnp.maximum(jnp.dot(h, p["w3"].T, precision=hp) + p["b3"].T, 0.0)
    return jnp.dot(h, p["w4"].T, precision=hp) + p["b4"].T


if __name__ == "__main__":
    key = jax.random.PRNGKey(0)
    k_params, k_x1, k_x2 = jax.random.split(key, 3)

    params = init_params(k_params)

    # Tolerance accommodates TPU matmul pass differences between the Mosaic
    # kernel and the XLA reference; any structural bug (layout/bias/slice)
    # produces O(0.1+) errors and would still trip these asserts.
    ATOL = RTOL = 2e-3

    # Small batch of planar-arm states, B deliberately NOT a multiple of the
    # tile to exercise the partial-last-block path (single grid step).
    B1 = 19
    x1 = jax.random.normal(k_x1, (B1, 3), dtype=jnp.float32)
    out1 = jax.block_until_ready(cbf_model_forward(x1, params))
    ref1 = _reference_forward(x1, params)
    assert out1.shape == (B1, 1)
    assert jnp.allclose(out1, ref1, atol=ATOL, rtol=RTOL)

    # Slightly larger batch to exercise the multi-tile (>=2 grid steps,
    # parallel axis) path plus a partial last block.
    B2 = 333
    x2 = jax.random.normal(k_x2, (B2, 3), dtype=jnp.float32)
    out2 = jax.block_until_ready(cbf_model_forward(x2, params))
    ref2 = _reference_forward(x2, params)
    assert out2.shape == (B2, 1)
    assert jnp.allclose(out2, ref2, atol=ATOL, rtol=RTOL)

    print("KERNEL_OK")
</pallas_src>

<mosaic_0001>
module attributes {stable_mosaic.version = 11 : i64} {
  func.func @_mlp_kernel(%arg0: i32, %arg1: memref<3x128xf32, #tpu.memory_space<vmem>>, %arg2: memref<16x3xf32, #tpu.memory_space<vmem>>, %arg3: memref<16x1xf32, #tpu.memory_space<vmem>>, %arg4: memref<64x16xf32, #tpu.memory_space<vmem>>, %arg5: memref<64x1xf32, #tpu.memory_space<vmem>>, %arg6: memref<16x64xf32, #tpu.memory_space<vmem>>, %arg7: memref<16x1xf32, #tpu.memory_space<vmem>>, %arg8: memref<1x16xf32, #tpu.memory_space<vmem>>, %arg9: memref<1x1xf32, #tpu.memory_space<vmem>>, %arg10: memref<1x128xf32, #tpu.memory_space<vmem>>) attributes {dimension_semantics = [#tpu.dimension_semantics<parallel>], iteration_bounds = array<i64: 1>, scalar_prefetch = 0 : i64, scratch_operands = 0 : i64, tpu.core_type = #tpu.core_type<tc>, window_params = [{transform_indices = @transform_0, window_bounds = array<i64: 3, 128>}, {pipeline_mode = #tpu.pipeline_mode<synchronous>, transform_indices = @transform_1, window_bounds = array<i64: 16, 3>}, {pipeline_mode = #tpu.pipeline_mode<synchronous>, transform_indices = @transform_2, window_bounds = array<i64: 16, 1>}, {pipeline_mode = #tpu.pipeline_mode<synchronous>, transform_indices = @transform_3, window_bounds = array<i64: 64, 16>}, {pipeline_mode = #tpu.pipeline_mode<synchronous>, transform_indices = @transform_4, window_bounds = array<i64: 64, 1>}, {pipeline_mode = #tpu.pipeline_mode<synchronous>, transform_indices = @transform_5, window_bounds = array<i64: 16, 64>}, {pipeline_mode = #tpu.pipeline_mode<synchronous>, transform_indices = @transform_6, window_bounds = array<i64: 16, 1>}, {pipeline_mode = #tpu.pipeline_mode<synchronous>, transform_indices = @transform_7, window_bounds = array<i64: 1, 16>}, {pipeline_mode = #tpu.pipeline_mode<synchronous>, transform_indices = @transform_8, window_bounds = array<i64: 1, 1>}, {transform_indices = @transform_9, window_bounds = array<i64: 1, 128>}]} {
    %c0 = arith.constant 0 : index
    %c0_0 = arith.constant 0 : index
    %0 = vector.load %arg1[%c0, %c0_0] : memref<3x128xf32, #tpu.memory_space<vmem>>, vector<3x128xf32>
    %c0_1 = arith.constant 0 : index
    %c0_2 = arith.constant 0 : index
    %1 = vector.load %arg2[%c0_1, %c0_2] : memref<16x3xf32, #tpu.memory_space<vmem>>, vector<16x3xf32>
    %cst = arith.constant dense<0.000000e+00> : vector<16x128xf32>
    %2 = tpu.matmul %1, %0, %cst {dimension_numbers = #tpu.dot_dimension_numbers<[1], [0], [0], [1], [0, 0, 1, 1], [], []>, precision = #tpu.contract_precision<fp32>} : vector<16x3xf32>, vector<3x128xf32>, vector<16x128xf32> -> vector<16x128xf32>
    %c0_3 = arith.constant 0 : index
    %c0_4 = arith.constant 0 : index
    %3 = vector.load %arg3[%c0_3, %c0_4] : memref<16x1xf32, #tpu.memory_space<vmem>>, vector<16x1xf32>
    %4 = vector.broadcast %3 : vector<16x1xf32> to vector<16x128xf32>
    %5 = arith.addf %2, %4 : vector<16x128xf32>
    %cst_5 = arith.constant 0.000000e+00 : f32
    %6 = vector.broadcast %cst_5 : f32 to vector<16x128xf32>
    %7 = arith.maximumf %5, %6 : vector<16x128xf32>
    %c0_6 = arith.constant 0 : index
    %c0_7 = arith.constant 0 : index
    %8 = vector.load %arg4[%c0_6, %c0_7] : memref<64x16xf32, #tpu.memory_space<vmem>>, vector<64x16xf32>
    %cst_8 = arith.constant dense<0.000000e+00> : vector<64x128xf32>
    %9 = tpu.matmul %8, %7, %cst_8 {dimension_numbers = #tpu.dot_dimension_numbers<[1], [0], [0], [1], [0, 0, 1, 1], [], []>, precision = #tpu.contract_precision<fp32>} : vector<64x16xf32>, vector<16x128xf32>, vector<64x128xf32> -> vector<64x128xf32>
    %c0_9 = arith.constant 0 : index
    %c0_10 = arith.constant 0 : index
    %10 = vector.load %arg5[%c0_9, %c0_10] : memref<64x1xf32, #tpu.memory_space<vmem>>, vector<64x1xf32>
    %11 = vector.broadcast %10 : vector<64x1xf32> to vector<64x128xf32>
    %12 = arith.addf %9, %11 : vector<64x128xf32>
    %cst_11 = arith.constant 0.000000e+00 : f32
    %13 = vector.broadcast %cst_11 : f32 to vector<64x128xf32>
    %14 = arith.maximumf %12, %13 : vector<64x128xf32>
    %c0_12 = arith.constant 0 : index
    %c0_13 = arith.constant 0 : index
    %15 = vector.load %arg6[%c0_12, %c0_13] : memref<16x64xf32, #tpu.memory_space<vmem>>, vector<16x64xf32>
    %cst_14 = arith.constant dense<0.000000e+00> : vector<16x128xf32>
    %16 = tpu.matmul %15, %14, %cst_14 {dimension_numbers = #tpu.dot_dimension_numbers<[1], [0], [0], [1], [0, 0, 1, 1], [], []>, precision = #tpu.contract_precision<fp32>} : vector<16x64xf32>, vector<64x128xf32>, vector<16x128xf32> -> vector<16x128xf32>
    %c0_15 = arith.constant 0 : index
    %c0_16 = arith.constant 0 : index
    %17 = vector.load %arg7[%c0_15, %c0_16] : memref<16x1xf32, #tpu.memory_space<vmem>>, vector<16x1xf32>
    %18 = vector.broadcast %17 : vector<16x1xf32> to vector<16x128xf32>
    %19 = arith.addf %16, %18 : vector<16x128xf32>
    %cst_17 = arith.constant 0.000000e+00 : f32
    %20 = vector.broadcast %cst_17 : f32 to vector<16x128xf32>
    %21 = arith.maximumf %19, %20 : vector<16x128xf32>
    %c0_18 = arith.constant 0 : index
    %c0_19 = arith.constant 0 : index
    %22 = vector.load %arg8[%c0_18, %c0_19] : memref<1x16xf32, #tpu.memory_space<vmem>>, vector<1x16xf32>
    %cst_20 = arith.constant dense<0.000000e+00> : vector<1x128xf32>
    %23 = tpu.matmul %22, %21, %cst_20 {dimension_numbers = #tpu.dot_dimension_numbers<[1], [0], [0], [1], [0, 0, 1, 1], [], []>, precision = #tpu.contract_precision<fp32>} : vector<1x16xf32>, vector<16x128xf32>, vector<1x128xf32> -> vector<1x128xf32>
    %c0_21 = arith.constant 0 : index
    %c0_22 = arith.constant 0 : index
    %24 = vector.load %arg9[%c0_21, %c0_22] : memref<1x1xf32, #tpu.memory_space<vmem>>, vector<1x1xf32>
    %25 = vector.broadcast %24 : vector<1x1xf32> to vector<1x128xf32>
    %26 = arith.addf %23, %25 : vector<1x128xf32>
    %c0_23 = arith.constant 0 : index
    %c0_24 = arith.constant 0 : index
    %27 = vector.load %arg10[%c0_23, %c0_24] : memref<1x128xf32, #tpu.memory_space<vmem>>, vector<1x128xf32>
    tpu.vector_store %arg10[%c0_23, %c0_24], %26 {strides = array<i32>} : memref<1x128xf32, #tpu.memory_space<vmem>>, vector<1x128xf32>,
    return
  }
  func.func @transform_0(%arg0: i32) -> (i32, i32) {
    %c0_i32 = arith.constant 0 : i32
    %c0_i32_0 = arith.constant 0 : i32
    return %c0_i32, %arg0 : i32, i32
  }
  func.func @transform_1(%arg0: i32) -> (i32, i32) {
    %c0_i32 = arith.constant 0 : i32
    %c0_i32_0 = arith.constant 0 : i32
    %c0_i32_1 = arith.constant 0 : i32
    return %c0_i32, %c0_i32_0 : i32, i32
  }
  func.func @transform_2(%arg0: i32) -> (i32, i32) {
    %c0_i32 = arith.constant 0 : i32
    %c0_i32_0 = arith.constant 0 : i32
    %c0_i32_1 = arith.constant 0 : i32
    return %c0_i32, %c0_i32_0 : i32, i32
  }
  func.func @transform_3(%arg0: i32) -> (i32, i32) {
    %c0_i32 = arith.constant 0 : i32
    %c0_i32_0 = arith.constant 0 : i32
    %c0_i32_1 = arith.constant 0 : i32
    return %c0_i32, %c0_i32_0 : i32, i32
  }
  func.func @transform_4(%arg0: i32) -> (i32, i32) {
    %c0_i32 = arith.constant 0 : i32
    %c0_i32_0 = arith.constant 0 : i32
    %c0_i32_1 = arith.constant 0 : i32
    return %c0_i32, %c0_i32_0 : i32, i32
  }
  func.func @transform_5(%arg0: i32) -> (i32, i32) {
    %c0_i32 = arith.constant 0 : i32
    %c0_i32_0 = arith.constant 0 : i32
    %c0_i32_1 = arith.constant 0 : i32
    return %c0_i32, %c0_i32_0 : i32, i32
  }
  func.func @transform_6(%arg0: i32) -> (i32, i32) {
    %c0_i32 = arith.constant 0 : i32
    %c0_i32_0 = arith.constant 0 : i32
    %c0_i32_1 = arith.constant 0 : i32
    return %c0_i32, %c0_i32_0 : i32, i32
  }
  func.func @transform_7(%arg0: i32) -> (i32, i32) {
    %c0_i32 = arith.constant 0 : i32
    %c0_i32_0 = arith.constant 0 : i32
    %c0_i32_1 = arith.constant 0 : i32
    return %c0_i32, %c0_i32_0 : i32, i32
  }
  func.func @transform_8(%arg0: i32) -> (i32, i32) {
    %c0_i32 = arith.constant 0 : i32
    %c0_i32_0 = arith.constant 0 : i32
    %c0_i32_1 = arith.constant 0 : i32
    return %c0_i32, %c0_i32_0 : i32, i32
  }
  func.func @transform_9(%arg0: i32) -> (i32, i32) {
    %c0_i32 = arith.constant 0 : i32
    %c0_i32_0 = arith.constant 0 : i32
    return %c0_i32, %arg0 : i32, i32
  }
}

</mosaic_0001>

<bundles_post_ra>
// kernel: cbf_model_forward.1
= control target key start
LH: loop header
LB: loop body
LE: loop exit
PB: predicated region body
PF: predicated region fallthrough
CT: control target
= control target key end

     0   :  { %vm56_vm0 = vcmask 1042432   ;;  %vm49_vm1 = vcmask 23552   ;;  %v1174_v0 = vmov 0   ;;  %vm295_vm2 = vcmask 130048   ;;  %s1487_s2 = inlined_call_operand.vmem [shape: f32[16,1], index: 2, kind: input, shape index: {}]   ;;  %s1488_s0 = inlined_call_operand.vmem [shape: f32[3,19], index: 0, kind: input, shape index: {}]   ;;  %s1489_s1 = inlined_call_operand.vmem [shape: f32[16,3], index: 1, kind: input, shape index: {}]   ;;  %s1490_s8 = inlined_call_operand.<no memory space> [shape: f32[1,1], index: 8, kind: input, shape index: {}]   ;;  %s1491_s4 = inlined_call_operand.vmem [shape: f32[64,1], index: 4, kind: input, shape index: {}]   ;;  %s1492_s3 = inlined_call_operand.vmem [shape: f32[64,16], index: 3, kind: input, shape index: {}]   ;;  %s1493_s6 = inlined_call_operand.vmem [shape: f32[16,1], index: 6, kind: input, shape index: {}]   ;;  %s1494_s5 = inlined_call_operand.vmem [shape: f32[16,64], index: 5, kind: input, shape index: {}]   ;;  %s1495_s7 = inlined_call_operand.vmem [shape: f32[1,16], index: 7, kind: input, shape index: {}]   ;;  %s1496_s9 = inlined_call_operand.vmem [shape: f32[1,128], index: 9, kind: output, shape index: {}]  }
   0x1   :  { %1171 = vset.pattern.permute.xlu0 %v1174_v0  ;;  %v38_v1 = vld [vmem:[%s1487_s2 + $0x8] sm:$0xff]  ;;  %v34_v2 = vld [vmem:[%s1488_s0] sm:$0x7]  ;;  %v14_v3 = vstv %s1490_s8  ;;  %1172 = vset.pattern.permute.xlu1 %v1174_v0  ;;  %v250_v24 = vld [vmem:[%s1491_s4 + $0x18] sm:$0xff]  ;;  %vm718_vm3 = vcmask 523264  }
   0x2   :  { %46 = vperm.xlu0 %1171, %v38_v1   ;;  %v58_v4 = vsel %vm56_vm0, %v34_v2, 0  ;;  %v35_v5 = vld [vmem:[%s1489_s1] sm:$0xff]  ;;  %v36_v6 = vld [vmem:[%s1489_s1 + $0x8] sm:$0xff]  ;;  %15 = vst [vmem:[#allocation2] sm:$0x1] %v14_v3  ;;  %1173 = vset.pattern.permute.xlu2 %v1174_v0  ;;  %v254_v54 = vld [vmem:[%s1491_s4 + $0x38] sm:$0xff] }
   0x3   :  { %v75_v7 = vand.u32 4294901760, %v58_v4  ;;  %v51_v8 = vsel %vm49_vm1, %v35_v5, 0  ;;  %v54_v9 = vsel %vm49_vm1, %v36_v6, 0  ;;  %v37_v15 = vld [vmem:[%s1487_s2] sm:$0xff]  ;;  %v240_v49 = vld [vmem:[%s1492_s3 + $0x8] sm:$0xff]  ;;  %292 = vperm.xlu1 %1172, %v254_v54   ;;  %v241_v0 = vld [vmem:[%s1492_s3 + $0x10] sm:$0xff] }
   0x4   :  { %v77_v10 = vand.u32 4294901760, %v51_v8  ;;  %v85_v11 = vand.u32 4294901760, %v54_v9  ;;  %v247_v26 = vld [vmem:[%s1491_s4] sm:$0xff]  ;;  %v300_v56 = vsel %vm295_vm2, %v240_v49, 0 }
   0x5   :  { %v110_v12 = vsub.f32 %v58_v4, %v75_v7  ;;  %76 = vmatpush.msra.mxu0 %v75_v7  ;;  %169 = vmatpush.msra.mxu3 %v75_v7  ;;  %v239_v38 = vld [vmem:[%s1492_s3] sm:$0xff]  ;;  %v1265_v61 = vand.u32 4294901760, %v300_v56  ;;  %v253_v4 = vld [vmem:[%s1491_s4 + $0x30] sm:$0xff] }
   0x6   :  { %v78_v13 = vsub.f32 %v51_v8, %v77_v10  ;;  %v86_v14 = vsub.f32 %v54_v9, %v85_v11  ;;  %v297_v41 = vsel %vm295_vm2, %v239_v38, 0 }
   0x7   :  { %141 = vmatpush.msra.mxu2 %v110_v12  ;;  %v111_v16 = vand.u32 4294901760, %v110_v12  ;;  %v1255_v47 = vand.u32 4294901760, %v297_v41  ;;  %v347_v3 = vsub.f32 %v300_v56, %v1265_v61 }
   0x8   :  { %144 = vmatmul.f32.vlgmr.msra.gmra.mxu2 %v78_v13  ;;  %v79_v17 = vand.u32 4294901760, %v78_v13  ;;  %v87_v20 = vand.u32 4294901760, %v86_v14 }
   0x9   :  { %v112_v18 = vsub.f32 %v110_v12, %v111_v16  ;;  %201 = vmatpush.msrb.mxu0 %v111_v16  ;;  %v996_v27 = vld [vmem:[#allocation2] sm:$0x1]  ;;  %v339_v53 = vsub.f32 %v297_v41, %v1255_v47 }
   0xa   :  { %41 = vperm.xlu0 %1171, %v37_v15   ;;  %v80_v19 = vsub.f32 %v78_v13, %v79_v17  ;;  %173 = vmatmul.f32.vlgmr.msra.gmra.mxu3 %v79_v17  ;;  %v88_v23 = vsub.f32 %v86_v14, %v87_v20 }
   0xb   :  { %v113_v21 = vand.u32 4294901760, %v112_v18  ;;  %v340_v60 = vand.u32 4294901760, %v339_v53  ;;  %287 = vperm.xlu1 %1172, %v253_v4   ;;  %v252_v18 = vld [vmem:[%s1491_s4 + $0x28] sm:$0xff] }
   0xc   :  { %v81_v22 = vand.u32 4294901760, %v80_v19  ;;  %v89_v25 = vand.u32 4294901760, %v88_v23  ;;  %282 = vperm.xlu2 %1173, %v252_v18  }
   0xd   :  { %114 = vmatpush.msra.mxu1 %v113_v21  ;;  %v341_v2 = vsub.f32 %v339_v53, %v340_v60 }
   0xe   :  { %82 = vmatmul.f32.vlgmr.msra.gmra.mxu0 %v81_v22  ;;  %116 = vmatmul.f32.vlgmr.msra.gmra.mxu1 %v77_v10  ;;  %v249_v22 = vld [vmem:[%s1491_s4 + $0x10] sm:$0xff] }
   0xf   :  { %227 = vmatpush.msrb.mxu1 %v75_v7  ;;  %v303_v7 = vsel %vm295_vm2, %v241_v0, 0  ;;  %v342_v9 = vand.u32 4294901760, %v341_v2  ;;  %v707_v2 = vld [vmem:[%s1493_s6 + $0x8] sm:$0xff] }
  0x10   :  { %149 = vmatmul.f32.gmra.mxu2 %v86_v14  ;;  %v242_v14 = vld [vmem:[%s1492_s3 + $0x18] sm:$0xff] }
  0x11   :  { %v306_v21 = vsel %vm295_vm2, %v242_v14, 0 }
  0x12   :  { %272 = vperm.xlu0 %1171, %v250_v24   ;;  %179 = vmatmul.f32.gmra.mxu3 %v87_v20 }
  0x13   :  { %267 = vperm.xlu1 %1172, %v249_v22  }
  0x16   :  { %90 = vmatmul.f32.gmra.mxu0 %v89_v25  ;;  %120 = vmatmul.f32.gmra.mxu1 %v85_v11 }
  0x1a   :  { %257 = vperm.xlu0 %1171, %v247_v26   ;;  %v1288_v26 = vand.u32 4294901760, %v306_v21 }
  0x1b   :  { %715 = vperm.xlu1 %1172, %v707_v2  }
  0x1e   :  { %203 = vmatmul.f32.vlgmr.msrb.gmra.mxu0 %v77_v10  ;;  %229 = vmatmul.f32.vlgmr.msrb.gmra.mxu1 %v77_v10  ;;  %v348_v10 = vand.u32 4294901760, %v347_v3 }
  0x20   :  { %v349_v16 = vsub.f32 %v347_v3, %v348_v10 }
  0x22   :  { %999 = vperm.xlu0 %1171, %v996_v27   ;;  %v350_v24 = vand.u32 4294901760, %v349_v16 }
  0x26   :  { %207 = vmatmul.f32.gmra.mxu0 %v85_v11  ;;  %233 = vmatmul.f32.gmra.mxu1 %v85_v11  ;;  %v1275_v11 = vand.u32 4294901760, %v303_v7 }
  0x28   :  { %v355_v17 = vsub.f32 %v303_v7, %v1275_v11 }
  0x2a   :  { %v356_v25 = vand.u32 4294901760, %v355_v17 }
  0x74   :  { %v47_v28 = vpop.permute.xlu0 %46 }
  0x75   :  { %v1337_v4 = vpop.permute.xlu1 %292 }
  0x7c   :  { %v42_v31 = vpop.permute.xlu0 %41 }
  0x8b   :  { %v83_v29 = vpop.f32.mrf.mxu0  ;;  %v117_v30 = vpop.f32.mrf.mxu1 }
  0x8c   :  { %v84_v32 = vadd.f32 %v83_v29, %v42_v31  ;;  %v145_v33 = vpop.f32.mrf.mxu2  ;;  %v357_v29 = vsub.f32 %v355_v17, %v356_v25  ;;  %v251_v31 = vld [vmem:[%s1491_s4 + $0x20] sm:$0xff] }
  0x8d   :  { %v174_v37 = vpop.f32.mrf.mxu3  ;;  %277 = vperm.xlu2 %1173, %v251_v31  }
  0x8e   :  { %v118_v34 = vadd.f32 %v117_v30, %v84_v32  ;;  %v363_v30 = vsub.f32 %v306_v21, %v1288_v26 }
  0x90   :  { %v146_v39 = vadd.f32 %v145_v33, %v118_v34  ;;  %v358_v33 = vand.u32 4294901760, %v357_v29  ;;  %v364_v34 = vand.u32 4294901760, %v363_v30 }
  0x92   :  { %v175_v42 = vadd.f32 %v174_v37, %v146_v39  ;;  %v365_v37 = vsub.f32 %v363_v30, %v364_v34  ;;  %v248_v39 = vld [vmem:[%s1491_s4 + $0x8] sm:$0xff] }
  0x93   :  { %v91_v35 = vpop.f32.mrf.mxu0  ;;  %v121_v36 = vpop.f32.mrf.mxu1 }
  0x94   :  { %v92_v40 = vadd.f32 %v91_v35, %v47_v28  ;;  %v150_v44 = vpop.f32.mrf.mxu2  ;;  %v243_v28 = vld [vmem:[%s1492_s3 + $0x20] sm:$0xff]  ;;  %v366_v41 = vand.u32 4294901760, %v365_v37 }
  0x95   :  { %v180_v52 = vpop.f32.mrf.mxu3  ;;  %v309_v32 = vsel %vm295_vm2, %v243_v28, 0  ;;  %262 = vperm.xlu2 %1173, %v248_v39  }
  0x96   :  { %v122_v43 = vadd.f32 %v121_v36, %v92_v40  ;;  %v1299_v35 = vand.u32 4294901760, %v309_v32  ;;  %v244_v36 = vld [vmem:[%s1492_s3 + $0x28] sm:$0xff] }
  0x97   :  { %v312_v40 = vsel %vm295_vm2, %v244_v36, 0 }
  0x98   :  { %v151_v50 = vadd.f32 %v150_v44, %v122_v43  ;;  %v371_v38 = vsub.f32 %v309_v32, %v1299_v35  ;;  %v378_v43 = vand.u32 4294901760, %v312_v40  ;;  %v245_v44 = vld [vmem:[%s1492_s3 + $0x30] sm:$0xff] }
  0x9a   :  { %v181_v57 = vadd.f32 %v180_v52, %v151_v50  ;;  %v246_v52 = vld [vmem:[%s1492_s3 + $0x38] sm:$0xff] }
  0x9b   :  { %v204_v45 = vpop.f32.mrf.mxu0  ;;  %v230_v46 = vpop.f32.mrf.mxu1 }
  0x9c   :  { %v205_v48 = vadd.f32 %v204_v45, %v175_v42  ;;  %v372_v42 = vand.u32 4294901760, %v371_v38 }
  0x9e   :  { %v231_v51 = vadd.f32 %v230_v46, %v205_v48  ;;  %v373_v45 = vsub.f32 %v371_v38, %v372_v42  ;;  %v379_v46 = vsub.f32 %v312_v40, %v378_v43  ;;  %v315_v48 = vsel %vm295_vm2, %v245_v44, 0 }
  0xa0   :  { %v237_v55 = vmax.f32 %v231_v51, 0.0  ;;  %v374_v49 = vand.u32 4294901760, %v373_v45  ;;  %v380_v50 = vand.u32 4294901760, %v379_v46  ;;  %v386_v51 = vand.u32 4294901760, %v315_v48 }
  0xa2   :  { %v336_v62 = vand.u32 4294901760, %v237_v55  ;;  %v387_v54 = vsub.f32 %v315_v48, %v386_v51 }
  0xa3   :  { %v208_v58 = vpop.f32.mrf.mxu0  ;;  %v234_v59 = vpop.f32.mrf.mxu1 }
  0xa4   :  { %v209_v63 = vadd.f32 %v208_v58, %v181_v57  ;;  %v424_v5 = vsub.f32 %v237_v55, %v336_v62  ;;  %v318_v55 = vsel %vm295_vm2, %v246_v52, 0  ;;  %v388_v57 = vand.u32 4294901760, %v387_v54 }
  0xa5   :  { %v394_v58 = vand.u32 4294901760, %v318_v55 }
  0xa6   :  { %v235_v1 = vadd.f32 %v234_v59, %v209_v63  ;;  %v425_v13 = vand.u32 4294901760, %v424_v5  ;;  %v389_v59 = vsub.f32 %v387_v54, %v388_v57 }
  0xa8   :  { %v238_v6 = vmax.f32 %v235_v1, 0.0  ;;  %v426_v20 = vsub.f32 %v424_v5, %v425_v13 }
  0xaa   :  { %v334_v8 = vand.u32 4294901760, %v238_v6  ;;  %v427_v27 = vand.u32 4294901760, %v426_v20 }
  0xac   :  { %v418_v12 = vsub.f32 %v238_v6, %v334_v8  ;;  %335 = vmatpush.msrb.mxu2 %v334_v8  ;;  %538 = vmatpush.msra.mxu1 %v334_v8 }
  0xae   :  { %337 = vmatpush.msrb.mxu2 %v336_v62  ;;  %478 = vmatpush.msra.mxu0 %v418_v12  ;;  %v419_v15 = vand.u32 4294901760, %v418_v12 }
  0xaf   :  { %540 = vmatpush.msra.mxu1 %v336_v62  ;;  %343 = vmatmul.f32.vlgmr.msrb.gmra.mxu2 %v342_v9 }
  0xb0   :  { %481 = vmatpush.msra.mxu0 %v424_v5  ;;  %607 = vmatpush.msra.mxu2 %v419_v15  ;;  %v420_v19 = vsub.f32 %v418_v12, %v419_v15 }
  0xb1   :  { %484 = vmatmul.f32.vlgmr.msra.gmra.mxu0 %v339_v53  ;;  %544 = vmatmul.f32.vlgmr.msra.gmra.mxu1 %v340_v60  ;;  %v381_v53 = vsub.f32 %v379_v46, %v380_v50  ;;  %v395_v60 = vsub.f32 %v318_v55, %v394_v58 }
  0xb2   :  { %611 = vmatpush.msra.mxu2 %v425_v13  ;;  %v421_v23 = vand.u32 4294901760, %v420_v19 }
  0xb3   :  { %v382_v56 = vand.u32 4294901760, %v381_v53  ;;  %v396_v63 = vand.u32 4294901760, %v395_v60 }
  0xb4   :  { %422 = vmatpush.msrb.mxu3 %v421_v23 }
  0xb5   :  { %v397_v0 = vsub.f32 %v395_v60, %v396_v63 }
  0xb6   :  { %428 = vmatpush.msrb.mxu3 %v427_v27 }
  0xb7   :  { %351 = vmatmul.f32.gmra.mxu2 %v350_v24  ;;  %430 = vmatmul.f32.vlgmr.msrb.gmra.mxu3 %v1255_v47  ;;  %v398_v1 = vand.u32 4294901760, %v397_v0 }
  0xb8   :  { %660 = vmatpush.msra.mxu3 %v334_v8 }
  0xb9   :  { %489 = vmatmul.f32.gmra.mxu0 %v347_v3  ;;  %550 = vmatmul.f32.gmra.mxu1 %v348_v10  ;;  %v273_v3 = vpop.permute.xlu0 %272  ;;  %v288_v10 = vpop.permute.xlu1 %287 }
  0xba   :  { %662 = vmatpush.msra.mxu3 %v336_v62  ;;  %v390_v62 = vand.u32 4294901760, %v389_v59 }
  0xbf   :  { %359 = vmatmul.f32.gmra.mxu2 %v358_v33  ;;  %434 = vmatmul.f32.gmra.mxu3 %v1265_v61 }
  0xc1   :  { %494 = vmatmul.f32.gmra.mxu0 %v355_v17  ;;  %556 = vmatmul.f32.gmra.mxu1 %v356_v25  ;;  %v258_v7 = vpop.permute.xlu0 %257  ;;  %v268_v22 = vpop.permute.xlu1 %267 }
  0xc7   :  { %367 = vmatmul.f32.gmra.mxu2 %v366_v41  ;;  %438 = vmatmul.f32.gmra.mxu3 %v1275_v11 }
  0xc9   :  { %499 = vmatmul.f32.gmra.mxu0 %v363_v30  ;;  %562 = vmatmul.f32.gmra.mxu1 %v364_v34 }
  0xcf   :  { %375 = vmatmul.f32.gmra.mxu2 %v374_v49  ;;  %442 = vmatmul.f32.gmra.mxu3 %v1288_v26 }
  0xd1   :  { %504 = vmatmul.f32.gmra.mxu0 %v371_v38  ;;  %568 = vmatmul.f32.gmra.mxu1 %v372_v42 }
  0xd7   :  { %383 = vmatmul.f32.gmra.mxu2 %v382_v56  ;;  %446 = vmatmul.f32.gmra.mxu3 %v1299_v35 }
  0xd9   :  { %509 = vmatmul.f32.gmra.mxu0 %v379_v46  ;;  %574 = vmatmul.f32.gmra.mxu1 %v380_v50 }
  0xdf   :  { %391 = vmatmul.f32.gmra.mxu2 %v390_v62  ;;  %450 = vmatmul.f32.gmra.mxu3 %v378_v43 }
  0xe1   :  { %514 = vmatmul.f32.gmra.mxu0 %v387_v54  ;;  %580 = vmatmul.f32.gmra.mxu1 %v388_v57 }
  0xe7   :  { %399 = vmatmul.f32.gmra.mxu2 %v398_v1  ;;  %454 = vmatmul.f32.gmra.mxu3 %v386_v51 }
  0xe9   :  { %519 = vmatmul.f32.gmra.mxu0 %v395_v60  ;;  %586 = vmatmul.f32.gmra.mxu1 %v396_v63 }
  0xef   :  { %458 = vmatmul.f32.gmra.mxu3 %v394_v58  ;;  %613 = vmatmul.f32.vlgmr.msra.gmra.mxu2 %v1255_v47 }
  0xf7   :  { %617 = vmatmul.f32.gmra.mxu2 %v1265_v61  ;;  %664 = vmatmul.f32.vlgmr.msra.gmra.mxu3 %v1255_v47  ;;  %v706_v47 = vld [vmem:[%s1493_s6] sm:$0xff] }
  0xf8   :  { %710 = vperm.xlu2 %1173, %v706_v47  }
  0xff   :  { %621 = vmatmul.f32.gmra.mxu2 %v1275_v11  ;;  %668 = vmatmul.f32.gmra.mxu3 %v1265_v61  ;;  %v283_v61 = vpop.permute.xlu2 %282 }
 0x107   :  { %625 = vmatmul.f32.gmra.mxu2 %v1288_v26  ;;  %672 = vmatmul.f32.gmra.mxu3 %v1275_v11  ;;  %v278_v6 = vpop.permute.xlu2 %277 }
 0x10f   :  { %629 = vmatmul.f32.gmra.mxu2 %v1299_v35  ;;  %676 = vmatmul.f32.gmra.mxu3 %v1288_v26  ;;  %v263_v15 = vpop.permute.xlu2 %262 }
 0x117   :  { %633 = vmatmul.f32.gmra.mxu2 %v378_v43  ;;  %680 = vmatmul.f32.gmra.mxu3 %v1299_v35 }
 0x11f   :  { %637 = vmatmul.f32.gmra.mxu2 %v386_v51  ;;  %684 = vmatmul.f32.gmra.mxu3 %v378_v43 }
 0x127   :  { %641 = vmatmul.f32.gmra.mxu2 %v394_v58  ;;  %688 = vmatmul.f32.gmra.mxu3 %v386_v51 }
 0x12e   :  { %v485_v9 = vpop.f32.mrf.mxu0  ;;  %v545_v14 = vpop.f32.mrf.mxu1 }
 0x12f   :  { %692 = vmatmul.f32.gmra.mxu3 %v394_v58 }
 0x132   :  { %v344_v5 = vpop.f32.mrf.mxu2 }
 0x133   :  { %v345_v8 = vadd.f32 %v344_v5, %v258_v7 }
 0x136   :  { %v490_v42 = vpop.f32.mrf.mxu0  ;;  %v551_v44 = vpop.f32.mrf.mxu1 }
 0x13a   :  { %v352_v11 = vpop.f32.mrf.mxu2  ;;  %v431_v12 = vpop.f32.mrf.mxu3 }
 0x13b   :  { %v432_v13 = vadd.f32 %v431_v12, %v345_v8  ;;  %v353_v18 = vadd.f32 %v352_v11, %v263_v15 }
 0x13d   :  { %v486_v16 = vadd.f32 %v485_v9, %v432_v13 }
 0x13e   :  { %v495_v49 = vpop.f32.mrf.mxu0  ;;  %v557_v50 = vpop.f32.mrf.mxu1 }
 0x13f   :  { %v546_v17 = vadd.f32 %v545_v14, %v486_v16 }
 0x142   :  { %v360_v19 = vpop.f32.mrf.mxu2  ;;  %v435_v20 = vpop.f32.mrf.mxu3 }
 0x143   :  { %v1339_v21 = vadd.f32 %v435_v20, %v353_v18  ;;  %v361_v23 = vadd.f32 %v360_v19, %v268_v22 }
 0x145   :  { %v491_v22 = vadd.f32 %v490_v42, %v1339_v21 }
 0x146   :  { %v500_v54 = vpop.f32.mrf.mxu0  ;;  %v563_v57 = vpop.f32.mrf.mxu1 }
 0x14a   :  { %v368_v24 = vpop.f32.mrf.mxu2  ;;  %v439_v25 = vpop.f32.mrf.mxu3 }
 0x14b   :  { %v440_v26 = vadd.f32 %v439_v25, %v361_v23  ;;  %v369_v27 = vadd.f32 %v368_v24, %v273_v3 }
 0x14d   :  { %v496_v16 = vadd.f32 %v495_v49, %v440_v26 }
 0x14e   :  { %v505_v58 = vpop.f32.mrf.mxu0  ;;  %v569_v62 = vpop.f32.mrf.mxu1 }
 0x152   :  { %v376_v28 = vpop.f32.mrf.mxu2  ;;  %v443_v29 = vpop.f32.mrf.mxu3 }
 0x153   :  { %v444_v30 = vadd.f32 %v443_v29, %v369_v27  ;;  %v377_v31 = vadd.f32 %v376_v28, %v278_v6  ;;  %v558_v29 = vadd.f32 %v557_v50, %v496_v16 }
 0x155   :  { %v501_v12 = vadd.f32 %v500_v54, %v444_v30 }
 0x156   :  { %v510_v1 = vpop.f32.mrf.mxu0  ;;  %v575_v2 = vpop.f32.mrf.mxu1 }
 0x157   :  { %v564_v23 = vadd.f32 %v563_v57, %v501_v12 }
 0x15a   :  { %v384_v32 = vpop.f32.mrf.mxu2  ;;  %v447_v33 = vpop.f32.mrf.mxu3 }
 0x15b   :  { %v448_v34 = vadd.f32 %v447_v33, %v377_v31  ;;  %v385_v35 = vadd.f32 %v384_v32, %v283_v61 }
 0x15d   :  { %v506_v11 = vadd.f32 %v505_v58, %v448_v34  ;;  %v552_v34 = vadd.f32 %v551_v44, %v491_v22  ;;  %v705_v58 = vld [vmem:[%s1494_s5 + $0x8] sm:$0xff] }
 0x15e   :  { %v515_v3 = vpop.f32.mrf.mxu0  ;;  %v581_v5 = vpop.f32.mrf.mxu1 }
 0x15f   :  { %v570_v18 = vadd.f32 %v569_v62, %v506_v11 }
 0x162   :  { %v392_v36 = vpop.f32.mrf.mxu2  ;;  %v451_v37 = vpop.f32.mrf.mxu3 }
 0x163   :  { %v452_v38 = vadd.f32 %v451_v37, %v385_v35  ;;  %v393_v39 = vadd.f32 %v392_v36, %v288_v10  ;;  %v704_v36 = vld [vmem:[%s1494_s5] sm:$0xff] }
 0x165   :  { %v511_v7 = vadd.f32 %v510_v1, %v452_v38 }
 0x166   :  { %v587_v31 = vpop.f32.mrf.mxu1 }
 0x167   :  { %v576_v13 = vadd.f32 %v575_v2, %v511_v7 }
 0x16a   :  { %v400_v40 = vpop.f32.mrf.mxu2  ;;  %v455_v41 = vpop.f32.mrf.mxu3 }
 0x16b   :  { %v456_v43 = vadd.f32 %v455_v41, %v393_v39  ;;  %v401_v8 = vadd.f32 %v400_v40, %v1337_v4 }
 0x16d   :  { %v516_v9 = vadd.f32 %v515_v3, %v456_v43  ;;  %v723_v3 = vsel %vm718_vm3, %v705_v58, 0 }
 0x16f   :  { %v582_v14 = vadd.f32 %v581_v5, %v516_v9 }
 0x172   :  { %v459_v45 = vpop.f32.mrf.mxu3  ;;  %v614_v46 = vpop.f32.mrf.mxu2 }
 0x173   :  { %v615_v48 = vadd.f32 %v614_v46, %v546_v17  ;;  %v460_v15 = vadd.f32 %v459_v45, %v401_v8  ;;  %v520_v17 = vpop.f32.mrf.mxu0  ;;  %v720_v45 = vsel %vm718_vm3, %v704_v36, 0 }
 0x174   :  { %v1353_v54 = vand.u32 4294901760, %v720_v45 }
 0x175   :  { %v521_v25 = vadd.f32 %v520_v17, %v460_v15 }
 0x176   :  { %v1374_v1 = vsub.f32 %v720_v45, %v1353_v54 }
 0x177   :  { %v588_v21 = vadd.f32 %v587_v31, %v521_v25 }
 0x178   :  { %v751_v9 = vand.u32 4294901760, %v1374_v1 }
 0x17a   :  { %v618_v51 = vpop.f32.mrf.mxu2  ;;  %v665_v52 = vpop.f32.mrf.mxu3 }
 0x17b   :  { %v1341_v53 = vadd.f32 %v665_v52, %v615_v48  ;;  %v619_v39 = vadd.f32 %v618_v51, %v552_v34 }
 0x182   :  { %v622_v55 = vpop.f32.mrf.mxu2  ;;  %v669_v56 = vpop.f32.mrf.mxu3 }
 0x183   :  { %v623_v35 = vadd.f32 %v622_v55, %v558_v29  ;;  %v670_v44 = vadd.f32 %v669_v56, %v619_v39 }
 0x18a   :  { %v626_v59 = vpop.f32.mrf.mxu2  ;;  %v673_v60 = vpop.f32.mrf.mxu3 }
 0x18b   :  { %v627_v32 = vadd.f32 %v626_v59, %v564_v23  ;;  %v674_v40 = vadd.f32 %v673_v60, %v623_v35  ;;  %v697_v59 = vmax.f32 %v670_v44, 0.0 }
 0x18d   :  { %v698_v52 = vmax.f32 %v674_v40, 0.0  ;;  %v1385_v5 = vand.u32 4294901760, %v697_v59 }
 0x18f   :  { %v1410_v15 = vsub.f32 %v697_v59, %v1385_v5  ;;  %v716_v59 = vpop.permute.xlu1 %715 }
 0x192   :  { %v630_v63 = vpop.f32.mrf.mxu2  ;;  %v677_v0 = vpop.f32.mrf.mxu3 }
 0x193   :  { %v631_v27 = vadd.f32 %v630_v63, %v570_v18  ;;  %v678_v37 = vadd.f32 %v677_v0, %v627_v32  ;;  %v696_v63 = vmax.f32 %v1341_v53, 0.0  ;;  %v1371_v0 = vand.u32 4294901760, %v698_v52 }
 0x195   :  { %v699_v48 = vmax.f32 %v678_v37, 0.0  ;;  %v1393_v8 = vand.u32 4294901760, %v696_v63  ;;  %v1399_v11 = vsub.f32 %v698_v52, %v1371_v0  ;;  %v995_v52 = vld [vmem:[%s1495_s7] sm:$0x1] }
 0x197   :  { %v1363_v60 = vand.u32 4294901760, %v699_v48  ;;  %v1424_v22 = vsub.f32 %v696_v63, %v1393_v8  ;;  %v806_v25 = vand.u32 4294901760, %v1399_v11 }
 0x199   :  { %v1388_v53 = vsub.f32 %v699_v48, %v1363_v60  ;;  %v711_v48 = vpop.permute.xlu2 %710 }
 0x19a   :  { %v634_v47 = vpop.f32.mrf.mxu2  ;;  %v681_v61 = vpop.f32.mrf.mxu3 }
 0x19b   :  { %v635_v19 = vadd.f32 %v634_v47, %v576_v13  ;;  %v682_v30 = vadd.f32 %v681_v61, %v631_v27  ;;  %v800_v18 = vand.u32 4294901760, %v1388_v53 }
 0x19d   :  { %v700_v41 = vmax.f32 %v682_v30, 0.0  ;;  %v807_v30 = vsub.f32 %v1399_v11, %v806_v25 }
 0x19f   :  { %v1355_v55 = vand.u32 4294901760, %v700_v41  ;;  %v808_v36 = vand.u32 4294901760, %v807_v30 }
 0x1a1   :  { %v1377_v2 = vsub.f32 %v700_v41, %v1355_v55 }
 0x1a2   :  { %v685_v6 = vpop.f32.mrf.mxu3  ;;  %v638_v10 = vpop.f32.mrf.mxu2 }
 0x1a3   :  { %v639_v20 = vadd.f32 %v638_v10, %v582_v14  ;;  %v686_v28 = vadd.f32 %v685_v6, %v635_v19  ;;  %v1396_v10 = vand.u32 4294901760, %v723_v3  ;;  %v794_v14 = vand.u32 4294901760, %v1377_v2 }
 0x1a4   :  { %v752_v19 = vsub.f32 %v1374_v1, %v751_v9 }
 0x1a5   :  { %v701_v38 = vmax.f32 %v686_v28, 0.0  ;;  %v801_v28 = vsub.f32 %v1388_v53, %v800_v18 }
 0x1a6   :  { %v753_v29 = vand.u32 4294901760, %v752_v19 }
 0x1a7   :  { %v1351_v49 = vand.u32 4294901760, %v701_v38  ;;  %v802_v34 = vand.u32 4294901760, %v801_v28 }
 0x1a9   :  { %v1366_v56 = vsub.f32 %v701_v38, %v1351_v49 }
 0x1aa   :  { %v689_v24 = vpop.f32.mrf.mxu3  ;;  %v642_v26 = vpop.f32.mrf.mxu2 }
 0x1ab   :  { %v690_v4 = vadd.f32 %v689_v24, %v639_v20  ;;  %v643_v42 = vadd.f32 %v642_v26, %v588_v21  ;;  %v788_v7 = vand.u32 4294901760, %v1366_v56  ;;  %v1421_v20 = vsub.f32 %v723_v3, %v1396_v10 }
 0x1ac   :  { %v795_v24 = vsub.f32 %v1377_v2, %v794_v14 }
 0x1ad   :  { %v702_v33 = vmax.f32 %v690_v4, 0.0  ;;  %v789_v17 = vsub.f32 %v1366_v56, %v788_v7  ;;  %v812_v4 = vand.u32 4294901760, %v1410_v15  ;;  %v759_v31 = vand.u32 4294901760, %v1421_v20 }
 0x1ae   :  { %v796_v32 = vand.u32 4294901760, %v795_v24 }
 0x1af   :  { %v1348_v43 = vand.u32 4294901760, %v702_v33  ;;  %v790_v27 = vand.u32 4294901760, %v789_v17  ;;  %v813_v35 = vsub.f32 %v1410_v15, %v812_v4  ;;  %v760_v26 = vsub.f32 %v1421_v20, %v759_v31 }
 0x1b1   :  { %v1358_v51 = vsub.f32 %v702_v33, %v1348_v43  ;;  %v818_v33 = vand.u32 4294901760, %v1424_v22  ;;  %v814_v37 = vand.u32 4294901760, %v813_v35  ;;  %v761_v38 = vand.u32 4294901760, %v760_v26 }
 0x1b2   :  { %v693_v46 = vpop.f32.mrf.mxu3 }
 0x1b3   :  { %v694_v50 = vadd.f32 %v693_v46, %v643_v42  ;;  %v782_v61 = vand.u32 4294901760, %v1358_v51  ;;  %v819_v21 = vsub.f32 %v1424_v22, %v818_v33 }
 0x1b5   :  { %v703_v57 = vmax.f32 %v694_v50, 0.0  ;;  %v783_v13 = vsub.f32 %v1358_v51, %v782_v61  ;;  %v820_v39 = vand.u32 4294901760, %v819_v21 }
 0x1b7   :  { %v1368_v62 = vand.u32 4294901760, %v703_v57  ;;  %v784_v23 = vand.u32 4294901760, %v783_v13 }
 0x1b9   :  { %v1380_v47 = vsub.f32 %v703_v57, %v1368_v62  ;;  %734 = vmatpush.msrb.mxu0 %v1368_v62 }
 0x1bb   :  { %v776_v6 = vand.u32 4294901760, %v1380_v47  ;;  %736 = vmatpush.msrb.mxu0 %v1348_v43 }
 0x1bd   :  { %v777_v12 = vsub.f32 %v1380_v47, %v776_v6  ;;  %738 = vmatpush.msrb.mxu0 %v1351_v49 }
 0x1bf   :  { %740 = vmatpush.msrb.mxu0 %v1355_v55  ;;  %v778_v16 = vand.u32 4294901760, %v777_v12 }
 0x1c1   :  { %742 = vmatpush.msrb.mxu0 %v1363_v60  ;;  %779 = vmatpush.msrb.mxu1 %v778_v16 }
 0x1c3   :  { %744 = vmatpush.msrb.mxu0 %v1371_v0  ;;  %785 = vmatpush.msrb.mxu1 %v784_v23  ;;  %v1000_v23 = vpop.permute.xlu0 %999 }
 0x1c5   :  { %746 = vmatpush.msrb.mxu0 %v1385_v5  ;;  %791 = vmatpush.msrb.mxu1 %v790_v27 }
 0x1c7   :  { %748 = vmatpush.msrb.mxu0 %v1393_v8  ;;  %797 = vmatpush.msrb.mxu1 %v796_v32 }
 0x1c8   :  { %754 = vmatmul.f32.vlgmr.msrb.gmra.mxu0 %v753_v29 }
 0x1c9   :  { %841 = vmatpush.msra.mxu0 %v1380_v47  ;;  %803 = vmatpush.msrb.mxu1 %v802_v34 }
 0x1cb   :  { %844 = vmatpush.msra.mxu0 %v1358_v51  ;;  %809 = vmatpush.msrb.mxu1 %v808_v36 }
 0x1cd   :  { %847 = vmatpush.msra.mxu0 %v1366_v56  ;;  %815 = vmatpush.msrb.mxu1 %v814_v37 }
 0x1cf   :  { %850 = vmatpush.msra.mxu0 %v1377_v2  ;;  %821 = vmatpush.msrb.mxu1 %v820_v39 }
 0x1d0   :  { %762 = vmatmul.f32.gmra.mxu0 %v761_v38  ;;  %823 = vmatmul.f32.vlgmr.msrb.gmra.mxu1 %v1353_v54 }
 0x1d1   :  { %853 = vmatpush.msra.mxu0 %v1388_v53  ;;  %883 = vmatpush.msra.mxu1 %v1368_v62 }
 0x1d3   :  { %856 = vmatpush.msra.mxu0 %v1399_v11  ;;  %885 = vmatpush.msra.mxu1 %v1348_v43 }
 0x1d5   :  { %859 = vmatpush.msra.mxu0 %v1410_v15  ;;  %887 = vmatpush.msra.mxu1 %v1351_v49 }
 0x1d7   :  { %862 = vmatpush.msra.mxu0 %v1424_v22  ;;  %889 = vmatpush.msra.mxu1 %v1355_v55 }
 0x1d8   :  { %827 = vmatmul.f32.gmra.mxu1 %v1396_v10  ;;  %865 = vmatmul.f32.vlgmr.msra.gmra.mxu0 %v1374_v1 }
 0x1d9   :  { %922 = vmatpush.msrb.mxu0 %v776_v6  ;;  %891 = vmatpush.msra.mxu1 %v1363_v60 }
 0x1db   :  { %926 = vmatpush.msrb.mxu0 %v782_v61  ;;  %893 = vmatpush.msra.mxu1 %v1371_v0 }
 0x1dd   :  { %930 = vmatpush.msrb.mxu0 %v788_v7  ;;  %895 = vmatpush.msra.mxu1 %v1385_v5 }
 0x1df   :  { %934 = vmatpush.msrb.mxu0 %v794_v14  ;;  %897 = vmatpush.msra.mxu1 %v1393_v8 }
 0x1e0   :  { %870 = vmatmul.f32.gmra.mxu0 %v1421_v20  ;;  %901 = vmatmul.f32.vlgmr.msra.gmra.mxu1 %v751_v9 }
 0x1e1   :  { %938 = vmatpush.msrb.mxu0 %v800_v18  ;;  %969 = vmatpush.msrb.mxu1 %v1368_v62 }
 0x1e3   :  { %942 = vmatpush.msrb.mxu0 %v806_v25  ;;  %971 = vmatpush.msrb.mxu1 %v1348_v43  ;;  %v1002_v25 = vperm.slane %v1000_v23, 0 }
 0x1e5   :  { %946 = vmatpush.msrb.mxu0 %v812_v4  ;;  %973 = vmatpush.msrb.mxu1 %v1351_v49 }
 0x1e7   :  { %950 = vmatpush.msrb.mxu0 %v818_v33  ;;  %975 = vmatpush.msrb.mxu1 %v1355_v55 }
 0x1e8   :  { %907 = vmatmul.f32.gmra.mxu1 %v759_v31  ;;  %952 = vmatmul.f32.vlgmr.msrb.gmra.mxu0 %v1353_v54 }
 0x1e9   :  { %977 = vmatpush.msrb.mxu1 %v1363_v60 }
 0x1eb   :  { %979 = vmatpush.msrb.mxu1 %v1371_v0 }
 0x1ed   :  { %981 = vmatpush.msrb.mxu1 %v1385_v5 }
 0x1ef   :  { %983 = vmatpush.msrb.mxu1 %v1393_v8 }
 0x1f0   :  { %956 = vmatmul.f32.gmra.mxu0 %v1396_v10  ;;  %985 = vmatmul.f32.vlgmr.msrb.gmra.mxu1 %v1353_v54  ;;  %v1004_v54 = vsel %vm295_vm2, %v995_v52, 0 }
 0x1f1   :  { %v1024_v60 = vand.u32 4294901760, %v1004_v54 }
 0x1f3   :  { %v1025_v2 = vsub.f32 %v1004_v54, %v1024_v60 }
 0x1f5   :  { %v1026_v53 = vand.u32 4294901760, %v1025_v2 }
 0x1f8   :  { %989 = vmatmul.f32.gmra.mxu1 %v1396_v10  ;;  %v1027_v10 = vsub.f32 %v1025_v2, %v1026_v53 }
 0x1fa   :  { %v1028_v14 = vand.u32 4294901760, %v1027_v10 }
 0x245   :  { %v755_v40 = vpop.f32.mrf.mxu0 }
 0x246   :  { %v756_v49 = vadd.f32 %v755_v40, %v711_v48 }
 0x24d   :  { %v763_v41 = vpop.f32.mrf.mxu0  ;;  %v824_v42 = vpop.f32.mrf.mxu1 }
 0x24e   :  { %v825_v55 = vadd.f32 %v824_v42, %v756_v49  ;;  %v764_v56 = vadd.f32 %v763_v41, %v716_v59 }
 0x255   :  { %v828_v43 = vpop.f32.mrf.mxu1  ;;  %v866_v45 = vpop.f32.mrf.mxu0 }
 0x256   :  { %v867_v57 = vadd.f32 %v866_v45, %v825_v55  ;;  %v829_v0 = vadd.f32 %v828_v43, %v764_v56 }
 0x25d   :  { %v871_v46 = vpop.f32.mrf.mxu0  ;;  %v902_v44 = vpop.f32.mrf.mxu1 }
 0x25e   :  { %v903_v58 = vadd.f32 %v902_v44, %v867_v57  ;;  %v872_v47 = vadd.f32 %v871_v46, %v829_v0 }
 0x265   :  { %v908_v50 = vpop.f32.mrf.mxu1  ;;  %v953_v51 = vpop.f32.mrf.mxu0 }
 0x266   :  { %v954_v62 = vadd.f32 %v953_v51, %v903_v58  ;;  %v909_v5 = vadd.f32 %v908_v50, %v872_v47 }
 0x26d   :  { %v986_v63 = vpop.f32.mrf.mxu1  ;;  %v957_v3 = vpop.f32.mrf.mxu0 }
 0x26e   :  { %v987_v1 = vadd.f32 %v986_v63, %v954_v62  ;;  %v958_v6 = vadd.f32 %v957_v3, %v909_v5 }
 0x270   :  { %v993_v61 = vmax.f32 %v987_v1, 0.0 }
 0x272   :  { %v1022_v7 = vand.u32 4294901760, %v993_v61 }
 0x274   :  { %v1054_v11 = vsub.f32 %v993_v61, %v1022_v7 }
 0x275   :  { %v990_v8 = vpop.f32.mrf.mxu1 }
 0x276   :  { %v991_v9 = vadd.f32 %v990_v8, %v958_v6  ;;  %v1055_v16 = vand.u32 4294901760, %v1054_v11 }
 0x278   :  { %v994_v12 = vmax.f32 %v991_v9, 0.0  ;;  %v1056_v19 = vsub.f32 %v1054_v11, %v1055_v16 }
 0x27a   :  { %v1020_v13 = vand.u32 4294901760, %v994_v12  ;;  %v1057_v22 = vand.u32 4294901760, %v1056_v19 }
 0x27c   :  { %v1048_v15 = vsub.f32 %v994_v12, %v1020_v13  ;;  %1021 = vmatpush.msra.mxu0 %v1020_v13  ;;  %1105 = vmatpush.msrb.mxu3 %v1020_v13 }
 0x27e   :  { %v1049_v17 = vand.u32 4294901760, %v1048_v15  ;;  %1023 = vmatpush.msra.mxu0 %v1022_v7  ;;  %1080 = vmatpush.msrb.mxu2 %v1048_v15 }
 0x27f   :  { %1107 = vmatpush.msrb.mxu3 %v1022_v7  ;;  %1029 = vmatmul.f32.vlgmr.msra.gmra.mxu0 %v1028_v14 }
 0x280   :  { %v1050_v18 = vsub.f32 %v1048_v15, %v1049_v17  ;;  %1083 = vmatpush.msrb.mxu2 %v1054_v11  ;;  %1132 = vmatpush.msrb.mxu0 %v1049_v17 }
 0x281   :  { %1086 = vmatmul.f32.vlgmr.msrb.gmra.mxu2 %v1025_v2  ;;  %1111 = vmatmul.f32.vlgmr.msrb.gmra.mxu3 %v1026_v53 }
 0x282   :  { %1136 = vmatpush.msrb.mxu0 %v1055_v16  ;;  %v1051_v20 = vand.u32 4294901760, %v1050_v18 }
 0x284   :  { %1052 = vmatpush.msra.mxu1 %v1051_v20 }
 0x286   :  { %1058 = vmatpush.msra.mxu1 %v1057_v22 }
 0x287   :  { %1060 = vmatmul.f32.vlgmr.msra.gmra.mxu1 %v1024_v60  ;;  %1138 = vmatmul.f32.vlgmr.msrb.gmra.mxu0 %v1024_v60 }
 0x288   :  { %1157 = vmatpush.msrb.mxu1 %v1020_v13 }
 0x28a   :  { %1159 = vmatpush.msrb.mxu1 %v1022_v7 }
 0x28f   :  { %1161 = vmatmul.f32.vlgmr.msrb.gmra.mxu1 %v1024_v60 }
 0x2fc   :  { %v1030_v24 = vpop.f32.mrf.mxu0 }
 0x2fd   :  { %v1031_v27 = vadd.f32 %v1030_v24, %v1002_v25 }
 0x304   :  { %v1061_v28 = vpop.f32.mrf.mxu1  ;;  %v1087_v4 = vpop.f32.mrf.mxu2 }
 0x305   :  { %v1062_v29 = vadd.f32 %v1061_v28, %v1031_v27  ;;  %v1112_v31 = vpop.f32.mrf.mxu3  ;;  %v1139_v30 = vpop.f32.mrf.mxu0 }
 0x307   :  { %v1088_v32 = vadd.f32 %v1087_v4, %v1062_v29 }
 0x309   :  { %v1113_v33 = vadd.f32 %v1112_v31, %v1088_v32 }
 0x30b   :  { %v1140_v34 = vadd.f32 %v1139_v30, %v1113_v33 }
 0x30c   :  { %v1162_v35 = vpop.f32.mrf.mxu1 }
 0x30d   :  { %v1163_v26 = vadd.f32 %v1162_v35, %v1140_v34 }
 0x30f   :  { %1165 = vst [vmem:[%s1496_s9] sm:$0x1] %v1163_v26 }

</bundles_post_ra>
